<compile_context>
chip_gen: v7x
topology: tpu7x:2x2x1
jax: 0.10.0
libtpu: 0.0.40
codegen_flags: <defaults>
</compile_context>

<pallas_src>
import jax
import jax.numpy as jnp
from jax import lax
from jax.experimental import pallas as pl
from jax.experimental.pallas import tpu as pltpu

BN_EPS = 1e-5


# ---------------------------------------------------------------------------
# Kernel
# ---------------------------------------------------------------------------
def _bn_relu(h, bn, mask, inv_b):
    """Train-mode BatchNorm1d (biased variance, eps=1e-5) + ReLU as one FMA.

    Two-pass statistics (mean, then centered second moment) avoid the
    catastrophic cancellation of E[x^2] - E[x]^2; `mask` zeroes the padded
    batch rows so they do not contribute to the statistics.
    """
    gamma, beta = bn[0:1, :], bn[1:2, :]
    mean = jnp.sum(h * mask, axis=0, keepdims=True) * inv_b
    centered = (h - mean) * mask
    var = jnp.sum(centered * centered, axis=0, keepdims=True) * inv_b
    scale = gamma * lax.rsqrt(var + BN_EPS)            # EUP rsqrt (free slot)
    shift = beta - mean * scale
    return jnp.maximum(h * scale + shift, 0.0)


def _mlp_kernel(nb_ref, x_img_ref, x_imu_ref, w1i_ref, w1u_ref, bn1_ref,
                w2_ref, bn2_ref, w3_ref, bn3_ref, w4_ref, b4_ref,
                o_ref, acc_ref):
    k = pl.program_id(0)
    nk = pl.num_programs(0)

    @pl.when(k == 0)
    def _():
        # Seed the layer-1 accumulator with the small resident IMU matmul:
        # removes the zero-fill and hides this dot under the first w1_img DMA
        # instead of leaving it in the serialized epilogue.
        acc_ref[...] = jnp.dot(x_imu_ref[...].astype(jnp.bfloat16),
                               w1u_ref[...],
                               preferred_element_type=jnp.float32)

    # Layer-1 image contribution, K-tiled across the grid.
    # bf16 operands on the MXU, f32 accumulation in resident VMEM scratch.
    acc_ref[...] += jnp.dot(x_img_ref[...].astype(jnp.bfloat16), w1i_ref[...],
                            preferred_element_type=jnp.float32)

    @pl.when(k == nk - 1)
    def _():
        batch_p = acc_ref.shape[0]
        real_b = nb_ref[0]                               # SMEM scalar
        mask = (lax.broadcasted_iota(jnp.int32, (batch_p, 1), 0) < real_b
                ).astype(jnp.float32)
        inv_b = 1.0 / real_b.astype(jnp.float32)

        # Pre-BN Linear biases are mathematically dead under train-mode BN
        # (batch-mean subtraction) and are dropped everywhere below.
        h = _bn_relu(acc_ref[...], bn1_ref[...], mask, inv_b)

        # Layers 2-4: tiny, fully resident, bf16 operands / f32 accumulation.
        h = _bn_relu(jnp.dot(h.astype(jnp.bfloat16), w2_ref[...],
                             preferred_element_type=jnp.float32),
                     bn2_ref[...], mask, inv_b)
        h = _bn_relu(jnp.dot(h.astype(jnp.bfloat16), w3_ref[...],
                             preferred_element_type=jnp.float32),
                     bn3_ref[...], mask, inv_b)

        # Layer 4: lane-dense, 128-wide padded output slab.
        o_ref[...] = (jnp.dot(h.astype(jnp.bfloat16), w4_ref[...],
                              preferred_element_type=jnp.float32)
                      + b4_ref[...])


# ---------------------------------------------------------------------------
# Parameters (deterministic, PyTorch-Linear-style uniform init)
# ---------------------------------------------------------------------------
def init_params(key, input_size, lin1, lin2, lin3, output_size):
    dims = [(input_size, lin1), (lin1, lin2), (lin2, lin3), (lin3, output_size)]
    ws, bs = [], []
    for i, (fan_in, fan_out) in enumerate(dims):
        kw, kb = jax.random.split(jax.random.fold_in(key, i))
        bound = 1.0 / float(fan_in) ** 0.5
        ws.append(jax.random.uniform(kw, (fan_in, fan_out), jnp.float32,
                                     -bound, bound))
        bs.append(jax.random.uniform(kb, (1, fan_out), jnp.float32,
                                     -bound, bound))
    # BatchNorm1d default init: gamma = 1, beta = 0, packed as (2, n).
    bn = [jnp.concatenate([jnp.ones((1, n), jnp.float32),
                           jnp.zeros((1, n), jnp.float32)], axis=0)
          for n in (lin1, lin2, lin3)]
    return {'w1': ws[0], 'b1': bs[0],
            'w2': ws[1], 'b2': bs[1],
            'w3': ws[2], 'b3': bs[2],
            'w4': ws[3], 'b4': bs[3],
            'bn1': bn[0], 'bn2': bn[1], 'bn3': bn[2]}


def _pick_tk(k_img):
    # Prefer the biggest lane-aligned tile that divides k_img exactly so the
    # forward pass never has to jnp.pad the activations along K.
    for t in (2048, 1024, 512, 256, 128):
        if k_img % t == 0:
            return t
    # No aligned divisor: single full-width tile if small, else pad K once in
    # prepare_params (and x per call, fallback path).
    return k_img if k_img < 2048 else 2048


def prepare_params(params, k_img):
    """One-time weight preparation, hoisted out of the per-call forward.

    Splits W1 into image/IMU parts, casts every matmul weight to bf16
    (MXU-native, halves steady-state HBM traffic on the dominant tensor),
    pads W1_img along K to the tile size and W4/b4 to a lane-dense 128-wide
    output slab.  Pre-BN biases b1/b2/b3 are intentionally not carried: they
    cancel exactly under train-mode BatchNorm.
    """
    w1, w2, w3 = params['w1'], params['w2'], params['w3']
    w4, b4 = params['w4'], params['b4']
    out_features = w4.shape[1]

    tk = _pick_tk(k_img)
    k_pad = -(-k_img // tk) * tk

    w1_img = w1[:k_img].astype(jnp.bfloat16)
    if k_pad != k_img:
        w1_img = jnp.pad(w1_img, ((0, k_pad - k_img), (0, 0)))
    w1_imu = w1[k_img:].astype(jnp.bfloat16)

    n_out = -(-out_features // 128) * 128
    w4p = jnp.pad(w4, ((0, 0), (0, n_out - out_features))).astype(jnp.bfloat16)
    b4p = jnp.pad(b4, ((0, 0), (0, n_out - out_features)))        # f32

    return {'k_img': k_img, 'tk': tk, 'out_features': out_features,
            'w1_img': w1_img, 'w1_imu': w1_imu,
            'w2': w2.astype(jnp.bfloat16), 'w3': w3.astype(jnp.bfloat16),
            'w4': w4p, 'b4': b4p,
            'bn1': params['bn1'], 'bn2': params['bn2'], 'bn3': params['bn3']}


# ---------------------------------------------------------------------------
# Wrapper (steady-state forward: no weight-side work per call)
# ---------------------------------------------------------------------------
def vio_simple_dense_net_forward(inputs, target, prepped, seq_len):
    imgs, imus, rot, weight = inputs          # rot / weight unused (as in torch)
    del target, rot, weight
    batch = imgs.shape[0]

    # Flatten; do NOT concat -- layer 1 takes two operands (img + imu).
    x_img = imgs.reshape(batch, -1).astype(jnp.float32)
    x_imu = imus.reshape(batch, -1).astype(jnp.float32)
    k_img, k_imu = x_img.shape[1], x_imu.shape[1]
    assert k_img == prepped['k_img'], (k_img, prepped['k_img'])

    tk = prepped['tk']
    w1_img, w1_imu = prepped['w1_img'], prepped['w1_imu']
    w2, w3, w4, b4 = prepped['w2'], prepped['w3'], prepped['w4'], prepped['b4']
    bn1, bn2, bn3 = prepped['bn1'], prepped['bn2'], prepped['bn3']
    out_features = prepped['out_features']
    k_pad, lin1 = w1_img.shape
    lin2, lin3 = w2.shape[1], w3.shape[1]
    n_out = w4.shape[1]
    nk = k_pad // tk

    # Batch padded to a multiple of 16 sublanes (bf16 packs 16 rows / vreg).
    # Padded rows are zero, masked out of BN stats and sliced off below.
    batch_p = max(16, -(-batch // 16) * 16)
    if batch_p != batch:
        x_img = jnp.pad(x_img, ((0, batch_p - batch), (0, 0)))
        x_imu = jnp.pad(x_imu, ((0, batch_p - batch), (0, 0)))
    if k_pad != k_img:
        # Fallback only: _pick_tk picks an exact divisor of k_img whenever one
        # exists, so this per-call pad is normally dead code.
        x_img = jnp.pad(x_img, ((0, 0), (0, k_pad - k_img)))

    nb = jnp.array([batch], dtype=jnp.int32)   # real batch, SMEM scalar prefetch

    tiled_x = lambda k, nb_ref: (0, k)
    tiled_w = lambda k, nb_ref: (k, 0)
    fixed = lambda k, nb_ref: (0, 0)

    in_specs = [
        pl.BlockSpec((batch_p, tk), tiled_x),    # x_img (K-tiled)
        pl.BlockSpec((batch_p, k_imu), fixed),   # x_imu (resident)
        pl.BlockSpec((tk, lin1), tiled_w),       # w1_img (K-tiled, bf16)
        pl.BlockSpec((k_imu, lin1), fixed),      # w1_imu (resident, bf16)
        pl.BlockSpec((2, lin1), fixed),          # bn1 (gamma, beta)
        pl.BlockSpec((lin1, lin2), fixed),       # w2 (bf16)
        pl.BlockSpec((2, lin2), fixed),          # bn2
        pl.BlockSpec((lin2, lin3), fixed),       # w3 (bf16)
        pl.BlockSpec((2, lin3), fixed),          # bn3
        pl.BlockSpec((lin3, n_out), fixed),      # w4 (bf16, lane-padded)
        pl.BlockSpec((1, n_out), fixed),         # b4 (f32, lane-padded)
    ]
    out_spec = pl.BlockSpec((batch_p, n_out), fixed)

    # Advisory cost estimate (layer 1 dominates both flops and bytes).
    flops = (2 * batch_p * (k_pad + k_imu) * lin1
             + 2 * batch_p * (lin1 * lin2 + lin2 * lin3 + lin3 * n_out))
    bytes_accessed = (batch_p * k_pad * 4 + batch_p * k_imu * 4
                      + k_pad * lin1 * 2 + k_imu * lin1 * 2
                      + (lin1 * lin2 + lin2 * lin3 + lin3 * n_out) * 2
                      + n_out * 4 + 2 * (lin1 + lin2 + lin3) * 4
                      + batch_p * n_out * 4)
    cost = pl.CostEstimate(flops=int(flops),
                           transcendentals=int(3 * (lin1 + lin2 + lin3)),
                           bytes_accessed=int(bytes_accessed))

    # VMEM budget: 2-deep pipelined layer-1 tiles + (conservatively double-
    # buffered) resident operands + accumulator + slack.  Generation-aware cap
    # leaves ~8 MiB headroom below physical VMEM (56 MiB usable on v7x,
    # up to ~120 MiB on v5e/v6e).
    tile_bytes = 2 * (batch_p * tk * 4 + tk * lin1 * 2)
    resident_bytes = 2 * (batch_p * k_imu * 4 + k_imu * lin1 * 2
                          + (lin1 * lin2 + lin2 * lin3 + lin3 * n_out) * 2
                          + n_out * 4 + 2 * (lin1 + lin2 + lin3) * 4
                          + batch_p * n_out * 4)
    acc_bytes = batch_p * lin1 * 4
    need = tile_bytes + resident_bytes + acc_bytes + (4 << 20)
    try:
        vmem_cap = pltpu.get_tpu_info().vmem_capacity_bytes
    except Exception:
        vmem_cap = 64 << 20
    vmem_limit = int(min(max(need, 32 << 20), vmem_cap - (8 << 20)))

    out = pl.pallas_call(
        _mlp_kernel,
        out_shape=jax.ShapeDtypeStruct((batch_p, n_out), jnp.float32),
        grid_spec=pltpu.PrefetchScalarGridSpec(
            num_scalar_prefetch=1,
            grid=(nk,),
            in_specs=in_specs,
            out_specs=out_spec,
            scratch_shapes=[pltpu.VMEM((batch_p, lin1), jnp.float32)]),
        compiler_params=pltpu.CompilerParams(
            dimension_semantics=("arbitrary",),   # K is a reduction axis
            vmem_limit_bytes=vmem_limit),
        cost_estimate=cost,
    )(nb, x_img, x_imu, w1_img, w1_imu, bn1, w2, bn2, w3, bn3, w4, b4)

    return out[:batch, :out_features].reshape(batch, seq_len - 1, 6)


# ---------------------------------------------------------------------------
# Pure-JAX reference (torch-faithful structure: pre-BN biases kept, two-pass
# BN; matmul operands cast to bf16 exactly as the kernel stores/uses them so
# the check isolates kernel correctness from quantization error).
# ---------------------------------------------------------------------------
def _reference(inputs, params, seq_len):
    imgs, imus, _, _ = inputs
    batch = imgs.shape[0]
    x_img = imgs.reshape(batch, -1).astype(jnp.float32)
    x_imu = imus.reshape(batch, -1).astype(jnp.float32)
    k_img = x_img.shape[1]

    def bdot(a, b):
        return jnp.dot(a.astype(jnp.bfloat16), b.astype(jnp.bfloat16),
                       preferred_element_type=jnp.float32)

    def bn_relu(h, bn):
        g, beta = bn[0:1, :], bn[1:2, :]
        m = h.mean(0, keepdims=True)
        v = ((h - m) ** 2).mean(0, keepdims=True)   # biased variance, 2-pass
        return jnp.maximum((h - m) / jnp.sqrt(v + BN_EPS) * g + beta, 0.0)

    h = (bdot(x_img, params['w1'][:k_img]) + bdot(x_imu, params['w1'][k_img:])
         + params['b1'])
    h = bn_relu(h, params['bn1'])
    h = bn_relu(bdot(h, params['w2']) + params['b2'], params['bn2'])
    h = bn_relu(bdot(h, params['w3']) + params['b3'], params['bn3'])
    out = bdot(h, params['w4']) + params['b4']
    return out.reshape(batch, seq_len - 1, 6)


if __name__ == "__main__":
    # Small, self-consistent configuration of the module.
    batch, seq_len, channels, height, width = 2, 3, 2, 8, 16
    imu_freq = 2
    lin1 = lin2 = lin3 = 32
    img_features = seq_len * channels * width * height                # 768
    input_size = img_features + ((seq_len - 1) * imu_freq + 1) * 6    # 768 + 30
    output_size = (seq_len - 1) * 6                                   # 12

    key = jax.random.PRNGKey(0)
    k_im, k_iu, k_rot, k_w, k_t, k_p = jax.random.split(key, 6)

    imgs = jax.random.normal(k_im, (batch, seq_len, channels, height, width),
                             jnp.float32)
    imus = jax.random.normal(k_iu, (batch, (seq_len - 1) * imu_freq + 1, 6),
                             jnp.float32)
    rot = jax.random.normal(k_rot, (batch, seq_len - 1, 3), jnp.float32)
    wgt = jax.random.normal(k_w, (batch, seq_len - 1), jnp.float32)
    target = jax.random.normal(k_t, (batch, seq_len - 1, 6), jnp.float32)

    params = init_params(k_p, input_size, lin1, lin2, lin3, output_size)
    prepped = prepare_params(params, img_features)    # one-time weight prep

    out = vio_simple_dense_net_forward((imgs, imus, rot, wgt), target,
                                       prepped, seq_len)
    out = jax.block_until_ready(out)
    assert out.shape == (batch, seq_len - 1, 6), out.shape

    ref = _reference((imgs, imus, rot, wgt), params, seq_len)
    max_err = float(jnp.max(jnp.abs(out - ref)))
    assert jnp.allclose(out, ref, atol=1e-2, rtol=1e-2), max_err

    print("KERNEL_OK")
</pallas_src>

<mosaic_0001>
module attributes {stable_mosaic.version = 11 : i64} {
  func.func @_mlp_kernel(%arg0: i32, %arg1: memref<1xi32, #tpu.memory_space<smem>>, %arg2: memref<16x256xf32, #tpu.memory_space<vmem>>, %arg3: memref<16x30xf32, #tpu.memory_space<vmem>>, %arg4: memref<256x32xbf16, #tpu.memory_space<vmem>>, %arg5: memref<30x32xbf16, #tpu.memory_space<vmem>>, %arg6: memref<2x32xf32, #tpu.memory_space<vmem>>, %arg7: memref<32x32xbf16, #tpu.memory_space<vmem>>, %arg8: memref<2x32xf32, #tpu.memory_space<vmem>>, %arg9: memref<32x32xbf16, #tpu.memory_space<vmem>>, %arg10: memref<2x32xf32, #tpu.memory_space<vmem>>, %arg11: memref<32x128xbf16, #tpu.memory_space<vmem>>, %arg12: memref<1x128xf32, #tpu.memory_space<vmem>>, %arg13: memref<16x128xf32, #tpu.memory_space<vmem>>, %arg14: memref<16x32xf32, #tpu.memory_space<vmem>>) attributes {dimension_semantics = [#tpu.dimension_semantics<arbitrary>], iteration_bounds = array<i64: 3>, scalar_prefetch = 1 : i64, scratch_operands = 1 : i64, tpu.core_type = #tpu.core_type<tc>, window_params = [{transform_indices = @transform_0, window_bounds = array<i64: 16, 256>}, {pipeline_mode = #tpu.pipeline_mode<synchronous>, transform_indices = @transform_1, window_bounds = array<i64: 16, 30>}, {transform_indices = @transform_2, window_bounds = array<i64: 256, 32>}, {pipeline_mode = #tpu.pipeline_mode<synchronous>, transform_indices = @transform_3, window_bounds = array<i64: 30, 32>}, {pipeline_mode = #tpu.pipeline_mode<synchronous>, transform_indices = @transform_4, window_bounds = array<i64: 2, 32>}, {pipeline_mode = #tpu.pipeline_mode<synchronous>, transform_indices = @transform_5, window_bounds = array<i64: 32, 32>}, {pipeline_mode = #tpu.pipeline_mode<synchronous>, transform_indices = @transform_6, window_bounds = array<i64: 2, 32>}, {pipeline_mode = #tpu.pipeline_mode<synchronous>, transform_indices = @transform_7, window_bounds = array<i64: 32, 32>}, {pipeline_mode = #tpu.pipeline_mode<synchronous>, transform_indices = @transform_8, window_bounds = array<i64: 2, 32>}, {pipeline_mode = #tpu.pipeline_mode<synchronous>, transform_indices = @transform_9, window_bounds = array<i64: 32, 128>}, {pipeline_mode = #tpu.pipeline_mode<synchronous>, transform_indices = @transform_10, window_bounds = array<i64: 1, 128>}, {pipeline_mode = #tpu.pipeline_mode<synchronous>, transform_indices = @transform_11, window_bounds = array<i64: 16, 128>}]} {
    %c0_i32 = arith.constant 0 : i32
    %0 = arith.cmpi eq, %arg0, %c0_i32 : i32
    %1 = arith.extui %0 : i1 to i32
    %c0_i32_0 = arith.constant 0 : i32
    %2 = arith.cmpi ne, %1, %c0_i32_0 : i32
    scf.if %2 {
      %c0_9 = arith.constant 0 : index
      %c0_10 = arith.constant 0 : index
      %13 = vector.load %arg3[%c0_9, %c0_10] : memref<16x30xf32, #tpu.memory_space<vmem>>, vector<16x30xf32>
      %14 = arith.truncf %13 : vector<16x30xf32> to vector<16x30xbf16>
      %c0_11 = arith.constant 0 : index
      %c0_12 = arith.constant 0 : index
      %15 = vector.load %arg5[%c0_11, %c0_12] : memref<30x32xbf16, #tpu.memory_space<vmem>>, vector<30x32xbf16>
      %cst_13 = arith.constant dense<0.000000e+00> : vector<16x32xf32>
      %16 = tpu.matmul %14, %15, %cst_13 {dimension_numbers = #tpu.dot_dimension_numbers<[1], [0], [0], [1], [0, 0, 1, 1], [], []>} : vector<16x30xbf16>, vector<30x32xbf16>, vector<16x32xf32> -> vector<16x32xf32>
      %c0_14 = arith.constant 0 : index
      %c0_15 = arith.constant 0 : index
      %17 = vector.load %arg14[%c0_14, %c0_15] : memref<16x32xf32, #tpu.memory_space<vmem>>, vector<16x32xf32>
      tpu.vector_store %arg14[%c0_14, %c0_15], %16 {strides = array<i32>} : memref<16x32xf32, #tpu.memory_space<vmem>>, vector<16x32xf32>,
    } else {
    }
    %c0 = arith.constant 0 : index
    %c0_1 = arith.constant 0 : index
    %3 = vector.load %arg14[%c0, %c0_1] : memref<16x32xf32, #tpu.memory_space<vmem>>, vector<16x32xf32>
    %c0_2 = arith.constant 0 : index
    %c0_3 = arith.constant 0 : index
    %4 = vector.load %arg2[%c0_2, %c0_3] : memref<16x256xf32, #tpu.memory_space<vmem>>, vector<16x256xf32>
    %5 = arith.truncf %4 : vector<16x256xf32> to vector<16x256xbf16>
    %c0_4 = arith.constant 0 : index
    %c0_5 = arith.constant 0 : index
    %6 = vector.load %arg4[%c0_4, %c0_5] : memref<256x32xbf16, #tpu.memory_space<vmem>>, vector<256x32xbf16>
    %cst = arith.constant dense<0.000000e+00> : vector<16x32xf32>
    %7 = tpu.matmul %5, %6, %cst {dimension_numbers = #tpu.dot_dimension_numbers<[1], [0], [0], [1], [0, 0, 1, 1], [], []>} : vector<16x256xbf16>, vector<256x32xbf16>, vector<16x32xf32> -> vector<16x32xf32>
    %8 = arith.addf %3, %7 : vector<16x32xf32>
    %c0_6 = arith.constant 0 : index
    %c0_7 = arith.constant 0 : index
    %9 = vector.load %arg14[%c0_6, %c0_7] : memref<16x32xf32, #tpu.memory_space<vmem>>, vector<16x32xf32>
    tpu.vector_store %arg14[%c0_6, %c0_7], %8 {strides = array<i32>} : memref<16x32xf32, #tpu.memory_space<vmem>>, vector<16x32xf32>,
    %c2_i32 = arith.constant 2 : i32
    %10 = arith.cmpi eq, %arg0, %c2_i32 : i32
    %11 = arith.extui %10 : i1 to i32
    %c0_i32_8 = arith.constant 0 : i32
    %12 = arith.cmpi ne, %11, %c0_i32_8 : i32
    scf.if %12 {
      %c0_9 = arith.constant 0 : index
      %13 = memref.load %arg1[%c0_9] : memref<1xi32, #tpu.memory_space<smem>>
      %14 = tpu.iota {dimensions = array<i32: 0>} : vector<16x1xi32>
      %15 = vector.broadcast %13 : i32 to vector<16x1xi32>
      %16 = arith.cmpi slt, %14, %15 : vector<16x1xi32>
      %17 = arith.extui %16 : vector<16x1xi1> to vector<16x1xi32>
      %18 = arith.sitofp %17 : vector<16x1xi32> to vector<16x1xf32>
      %19 = arith.sitofp %13 : i32 to f32
      %cst_10 = arith.constant 1.000000e+00 : f32
      %20 = arith.divf %cst_10, %19 : f32
      %c0_11 = arith.constant 0 : index
      %c0_12 = arith.constant 0 : index
      %21 = vector.load %arg14[%c0_11, %c0_12] : memref<16x32xf32, #tpu.memory_space<vmem>>, vector<16x32xf32>
      %c0_13 = arith.constant 0 : index
      %c0_14 = arith.constant 0 : index
      %22 = vector.load %arg6[%c0_13, %c0_14] : memref<2x32xf32, #tpu.memory_space<vmem>>, vector<2x32xf32>
      %23 = vector.extract_strided_slice %22 {offsets = [0, 0], sizes = [1, 32], strides = [1, 1]} : vector<2x32xf32> to vector<1x32xf32>
      %24 = vector.extract_strided_slice %22 {offsets = [1, 0], sizes = [1, 32], strides = [1, 1]} : vector<2x32xf32> to vector<1x32xf32>
      %25 = vector.broadcast %18 : vector<16x1xf32> to vector<16x32xf32>
      %26 = arith.mulf %21, %25 : vector<16x32xf32>
      %cst_15 = arith.constant dense<0.000000e+00> : vector<32xf32>
      %27 = vector.multi_reduction <add>, %26, %cst_15 [0] : vector<16x32xf32> to vector<32xf32>
      %28 = vector.shape_cast %27 : vector<32xf32> to vector<1x32xf32>
      %29 = vector.broadcast %20 : f32 to vector<1x32xf32>
      %30 = arith.mulf %28, %29 : vector<1x32xf32>
      %31 = vector.broadcast %30 : vector<1x32xf32> to vector<16x32xf32>
      %32 = arith.subf %21, %31 : vector<16x32xf32>
      %33 = vector.broadcast %18 : vector<16x1xf32> to vector<16x32xf32>
      %34 = arith.mulf %32, %33 : vector<16x32xf32>
      %35 = arith.mulf %34, %34 : vector<16x32xf32>
      %cst_16 = arith.constant dense<0.000000e+00> : vector<32xf32>
      %36 = vector.multi_reduction <add>, %35, %cst_16 [0] : vector<16x32xf32> to vector<32xf32>
      %37 = vector.shape_cast %36 : vector<32xf32> to vector<1x32xf32>
      %38 = vector.broadcast %20 : f32 to vector<1x32xf32>
      %39 = arith.mulf %37, %38 : vector<1x32xf32>
      %cst_17 = arith.constant 9.99999974E-6 : f32
      %40 = vector.broadcast %cst_17 : f32 to vector<1x32xf32>
      %41 = arith.addf %39, %40 : vector<1x32xf32>
      %42 = math.rsqrt %41 : vector<1x32xf32>
      %43 = arith.mulf %23, %42 : vector<1x32xf32>
      %44 = arith.mulf %30, %43 : vector<1x32xf32>
      %45 = arith.subf %24, %44 : vector<1x32xf32>
      %46 = vector.broadcast %43 : vector<1x32xf32> to vector<16x32xf32>
      %47 = arith.mulf %21, %46 : vector<16x32xf32>
      %48 = vector.broadcast %45 : vector<1x32xf32> to vector<16x32xf32>
      %49 = arith.addf %47, %48 : vector<16x32xf32>
      %cst_18 = arith.constant 0.000000e+00 : f32
      %50 = vector.broadcast %cst_18 : f32 to vector<16x32xf32>
      %51 = arith.maximumf %49, %50 : vector<16x32xf32>
      %52 = arith.truncf %51 : vector<16x32xf32> to vector<16x32xbf16>
      %c0_19 = arith.constant 0 : index
      %c0_20 = arith.constant 0 : index
      %53 = vector.load %arg7[%c0_19, %c0_20] : memref<32x32xbf16, #tpu.memory_space<vmem>>, vector<32x32xbf16>
      %cst_21 = arith.constant dense<0.000000e+00> : vector<16x32xf32>
      %54 = tpu.matmul %52, %53, %cst_21 {dimension_numbers = #tpu.dot_dimension_numbers<[1], [0], [0], [1], [0, 0, 1, 1], [], []>} : vector<16x32xbf16>, vector<32x32xbf16>, vector<16x32xf32> -> vector<16x32xf32>
      %c0_22 = arith.constant 0 : index
      %c0_23 = arith.constant 0 : index
      %55 = vector.load %arg8[%c0_22, %c0_23] : memref<2x32xf32, #tpu.memory_space<vmem>>, vector<2x32xf32>
      %56 = vector.extract_strided_slice %55 {offsets = [0, 0], sizes = [1, 32], strides = [1, 1]} : vector<2x32xf32> to vector<1x32xf32>
      %57 = vector.extract_strided_slice %55 {offsets = [1, 0], sizes = [1, 32], strides = [1, 1]} : vector<2x32xf32> to vector<1x32xf32>
      %58 = vector.broadcast %18 : vector<16x1xf32> to vector<16x32xf32>
      %59 = arith.mulf %54, %58 : vector<16x32xf32>
      %cst_24 = arith.constant dense<0.000000e+00> : vector<32xf32>
      %60 = vector.multi_reduction <add>, %59, %cst_24 [0] : vector<16x32xf32> to vector<32xf32>
      %61 = vector.shape_cast %60 : vector<32xf32> to vector<1x32xf32>
      %62 = vector.broadcast %20 : f32 to vector<1x32xf32>
      %63 = arith.mulf %61, %62 : vector<1x32xf32>
      %64 = vector.broadcast %63 : vector<1x32xf32> to vector<16x32xf32>
      %65 = arith.subf %54, %64 : vector<16x32xf32>
      %66 = vector.broadcast %18 : vector<16x1xf32> to vector<16x32xf32>
      %67 = arith.mulf %65, %66 : vector<16x32xf32>
      %68 = arith.mulf %67, %67 : vector<16x32xf32>
      %cst_25 = arith.constant dense<0.000000e+00> : vector<32xf32>
      %69 = vector.multi_reduction <add>, %68, %cst_25 [0] : vector<16x32xf32> to vector<32xf32>
      %70 = vector.shape_cast %69 : vector<32xf32> to vector<1x32xf32>
      %71 = vector.broadcast %20 : f32 to vector<1x32xf32>
      %72 = arith.mulf %70, %71 : vector<1x32xf32>
      %cst_26 = arith.constant 9.99999974E-6 : f32
      %73 = vector.broadcast %cst_26 : f32 to vector<1x32xf32>
      %74 = arith.addf %72, %73 : vector<1x32xf32>
      %75 = math.rsqrt %74 : vector<1x32xf32>
      %76 = arith.mulf %56, %75 : vector<1x32xf32>
      %77 = arith.mulf %63, %76 : vector<1x32xf32>
      %78 = arith.subf %57, %77 : vector<1x32xf32>
      %79 = vector.broadcast %76 : vector<1x32xf32> to vector<16x32xf32>
      %80 = arith.mulf %54, %79 : vector<16x32xf32>
      %81 = vector.broadcast %78 : vector<1x32xf32> to vector<16x32xf32>
      %82 = arith.addf %80, %81 : vector<16x32xf32>
      %cst_27 = arith.constant 0.000000e+00 : f32
      %83 = vector.broadcast %cst_27 : f32 to vector<16x32xf32>
      %84 = arith.maximumf %82, %83 : vector<16x32xf32>
      %85 = arith.truncf %84 : vector<16x32xf32> to vector<16x32xbf16>
      %c0_28 = arith.constant 0 : index
      %c0_29 = arith.constant 0 : index
      %86 = vector.load %arg9[%c0_28, %c0_29] : memref<32x32xbf16, #tpu.memory_space<vmem>>, vector<32x32xbf16>
      %cst_30 = arith.constant dense<0.000000e+00> : vector<16x32xf32>
      %87 = tpu.matmul %85, %86, %cst_30 {dimension_numbers = #tpu.dot_dimension_numbers<[1], [0], [0], [1], [0, 0, 1, 1], [], []>} : vector<16x32xbf16>, vector<32x32xbf16>, vector<16x32xf32> -> vector<16x32xf32>
      %c0_31 = arith.constant 0 : index
      %c0_32 = arith.constant 0 : index
      %88 = vector.load %arg10[%c0_31, %c0_32] : memref<2x32xf32, #tpu.memory_space<vmem>>, vector<2x32xf32>
      %89 = vector.extract_strided_slice %88 {offsets = [0, 0], sizes = [1, 32], strides = [1, 1]} : vector<2x32xf32> to vector<1x32xf32>
      %90 = vector.extract_strided_slice %88 {offsets = [1, 0], sizes = [1, 32], strides = [1, 1]} : vector<2x32xf32> to vector<1x32xf32>
      %91 = vector.broadcast %18 : vector<16x1xf32> to vector<16x32xf32>
      %92 = arith.mulf %87, %91 : vector<16x32xf32>
      %cst_33 = arith.constant dense<0.000000e+00> : vector<32xf32>
      %93 = vector.multi_reduction <add>, %92, %cst_33 [0] : vector<16x32xf32> to vector<32xf32>
      %94 = vector.shape_cast %93 : vector<32xf32> to vector<1x32xf32>
      %95 = vector.broadcast %20 : f32 to vector<1x32xf32>
      %96 = arith.mulf %94, %95 : vector<1x32xf32>
      %97 = vector.broadcast %96 : vector<1x32xf32> to vector<16x32xf32>
      %98 = arith.subf %87, %97 : vector<16x32xf32>
      %99 = vector.broadcast %18 : vector<16x1xf32> to vector<16x32xf32>
      %100 = arith.mulf %98, %99 : vector<16x32xf32>
      %101 = arith.mulf %100, %100 : vector<16x32xf32>
      %cst_34 = arith.constant dense<0.000000e+00> : vector<32xf32>
      %102 = vector.multi_reduction <add>, %101, %cst_34 [0] : vector<16x32xf32> to vector<32xf32>
      %103 = vector.shape_cast %102 : vector<32xf32> to vector<1x32xf32>
      %104 = vector.broadcast %20 : f32 to vector<1x32xf32>
      %105 = arith.mulf %103, %104 : vector<1x32xf32>
      %cst_35 = arith.constant 9.99999974E-6 : f32
      %106 = vector.broadcast %cst_35 : f32 to vector<1x32xf32>
      %107 = arith.addf %105, %106 : vector<1x32xf32>
      %108 = math.rsqrt %107 : vector<1x32xf32>
      %109 = arith.mulf %89, %108 : vector<1x32xf32>
      %110 = arith.mulf %96, %109 : vector<1x32xf32>
      %111 = arith.subf %90, %110 : vector<1x32xf32>
      %112 = vector.broadcast %109 : vector<1x32xf32> to vector<16x32xf32>
      %113 = arith.mulf %87, %112 : vector<16x32xf32>
      %114 = vector.broadcast %111 : vector<1x32xf32> to vector<16x32xf32>
      %115 = arith.addf %113, %114 : vector<16x32xf32>
      %cst_36 = arith.constant 0.000000e+00 : f32
      %116 = vector.broadcast %cst_36 : f32 to vector<16x32xf32>
      %117 = arith.maximumf %115, %116 : vector<16x32xf32>
      %118 = arith.truncf %117 : vector<16x32xf32> to vector<16x32xbf16>
      %c0_37 = arith.constant 0 : index
      %c0_38 = arith.constant 0 : index
      %119 = vector.load %arg11[%c0_37, %c0_38] : memref<32x128xbf16, #tpu.memory_space<vmem>>, vector<32x128xbf16>
      %cst_39 = arith.constant dense<0.000000e+00> : vector<16x128xf32>
      %120 = tpu.matmul %118, %119, %cst_39 {dimension_numbers = #tpu.dot_dimension_numbers<[1], [0], [0], [1], [0, 0, 1, 1], [], []>} : vector<16x32xbf16>, vector<32x128xbf16>, vector<16x128xf32> -> vector<16x128xf32>
      %c0_40 = arith.constant 0 : index
      %c0_41 = arith.constant 0 : index
      %121 = vector.load %arg12[%c0_40, %c0_41] : memref<1x128xf32, #tpu.memory_space<vmem>>, vector<1x128xf32>
      %122 = vector.broadcast %121 : vector<1x128xf32> to vector<16x128xf32>
      %123 = arith.addf %120, %122 : vector<16x128xf32>
      %c0_42 = arith.constant 0 : index
      %c0_43 = arith.constant 0 : index
      %124 = vector.load %arg13[%c0_42, %c0_43] : memref<16x128xf32, #tpu.memory_space<vmem>>, vector<16x128xf32>
      tpu.vector_store %arg13[%c0_42, %c0_43], %123 {strides = array<i32>} : memref<16x128xf32, #tpu.memory_space<vmem>>, vector<16x128xf32>,
    } else {
    }
    return
  }
  func.func @transform_0(%arg0: i32, %arg1: memref<1xi32, #tpu.memory_space<smem>>) -> (i32, i32) {
    %c0_i32 = arith.constant 0 : i32
    %c0_i32_0 = arith.constant 0 : i32
    return %c0_i32, %arg0 : i32, i32
  }
  func.func @transform_1(%arg0: i32, %arg1: memref<1xi32, #tpu.memory_space<smem>>) -> (i32, i32) {
    %c0_i32 = arith.constant 0 : i32
    %c0_i32_0 = arith.constant 0 : i32
    %c0_i32_1 = arith.constant 0 : i32
    return %c0_i32, %c0_i32_0 : i32, i32
  }
  func.func @transform_2(%arg0: i32, %arg1: memref<1xi32, #tpu.memory_space<smem>>) -> (i32, i32) {
    %c0_i32 = arith.constant 0 : i32
    %c0_i32_0 = arith.constant 0 : i32
    return %arg0, %c0_i32 : i32, i32
  }
  func.func @transform_3(%arg0: i32, %arg1: memref<1xi32, #tpu.memory_space<smem>>) -> (i32, i32) {
    %c0_i32 = arith.constant 0 : i32
    %c0_i32_0 = arith.constant 0 : i32
    %c0_i32_1 = arith.constant 0 : i32
    return %c0_i32, %c0_i32_0 : i32, i32
  }
  func.func @transform_4(%arg0: i32, %arg1: memref<1xi32, #tpu.memory_space<smem>>) -> (i32, i32) {
    %c0_i32 = arith.constant 0 : i32
    %c0_i32_0 = arith.constant 0 : i32
    %c0_i32_1 = arith.constant 0 : i32
    return %c0_i32, %c0_i32_0 : i32, i32
  }
  func.func @transform_5(%arg0: i32, %arg1: memref<1xi32, #tpu.memory_space<smem>>) -> (i32, i32) {
    %c0_i32 = arith.constant 0 : i32
    %c0_i32_0 = arith.constant 0 : i32
    %c0_i32_1 = arith.constant 0 : i32
    return %c0_i32, %c0_i32_0 : i32, i32
  }
  func.func @transform_6(%arg0: i32, %arg1: memref<1xi32, #tpu.memory_space<smem>>) -> (i32, i32) {
    %c0_i32 = arith.constant 0 : i32
    %c0_i32_0 = arith.constant 0 : i32
    %c0_i32_1 = arith.constant 0 : i32
    return %c0_i32, %c0_i32_0 : i32, i32
  }
  func.func @transform_7(%arg0: i32, %arg1: memref<1xi32, #tpu.memory_space<smem>>) -> (i32, i32) {
    %c0_i32 = arith.constant 0 : i32
    %c0_i32_0 = arith.constant 0 : i32
    %c0_i32_1 = arith.constant 0 : i32
    return %c0_i32, %c0_i32_0 : i32, i32
  }
  func.func @transform_8(%arg0: i32, %arg1: memref<1xi32, #tpu.memory_space<smem>>) -> (i32, i32) {
    %c0_i32 = arith.constant 0 : i32
    %c0_i32_0 = arith.constant 0 : i32
    %c0_i32_1 = arith.constant 0 : i32
    return %c0_i32, %c0_i32_0 : i32, i32
  }
  func.func @transform_9(%arg0: i32, %arg1: memref<1xi32, #tpu.memory_space<smem>>) -> (i32, i32) {
    %c0_i32 = arith.constant 0 : i32
    %c0_i32_0 = arith.constant 0 : i32
    %c0_i32_1 = arith.constant 0 : i32
    return %c0_i32, %c0_i32_0 : i32, i32
  }
  func.func @transform_10(%arg0: i32, %arg1: memref<1xi32, #tpu.memory_space<smem>>) -> (i32, i32) {
    %c0_i32 = arith.constant 0 : i32
    %c0_i32_0 = arith.constant 0 : i32
    %c0_i32_1 = arith.constant 0 : i32
    return %c0_i32, %c0_i32_0 : i32, i32
  }
  func.func @transform_11(%arg0: i32, %arg1: memref<1xi32, #tpu.memory_space<smem>>) -> (i32, i32) {
    %c0_i32 = arith.constant 0 : i32
    %c0_i32_0 = arith.constant 0 : i32
    %c0_i32_1 = arith.constant 0 : i32
    return %c0_i32, %c0_i32_0 : i32, i32
  }
}

</mosaic_0001>

<bundles_post_ra>
// kernel: tpu_custom_call.1
= control target key start
LH: loop header
LB: loop body
LE: loop exit
PB: predicated region body
PF: predicated region fallthrough
CT: control target
= control target key end

     0   :  { %s1637_s0 = inlined_call_operand.<no memory space> [shape: s32[1], index: 0, kind: input, shape index: {}]   ;;  %s1638_s1 = inlined_call_operand.vmem [shape: f32[16,768], index: 1, kind: input, shape index: {}]   ;;  %s1639_s2 = inlined_call_operand.vmem [shape: f32[16,30], index: 2, kind: input, shape index: {}]   ;;  %s1640_s3 = inlined_call_operand.vmem [shape: bf16[768,32], index: 3, kind: input, shape index: {}]   ;;  %s1641_s4 = inlined_call_operand.vmem [shape: bf16[30,32], index: 4, kind: input, shape index: {}]   ;;  %s1642_s5 = inlined_call_operand.vmem [shape: f32[2,32], index: 5, kind: input, shape index: {}]   ;;  %s1643_s6 = inlined_call_operand.vmem [shape: bf16[32,32], index: 6, kind: input, shape index: {}]   ;;  %s1644_s7 = inlined_call_operand.vmem [shape: f32[2,32], index: 7, kind: input, shape index: {}]   ;;  %s1645_s8 = inlined_call_operand.vmem [shape: bf16[32,32], index: 8, kind: input, shape index: {}]   ;;  %s1646_s9 = inlined_call_operand.vmem [shape: f32[2,32], index: 9, kind: input, shape index: {}]   ;;  %s1647_s10 = inlined_call_operand.vmem [shape: bf16[32,128], index: 10, kind: input, shape index: {}]   ;;  %s1648_s11 = inlined_call_operand.vmem [shape: f32[1,128], index: 11, kind: input, shape index: {}]   ;;  %s1649_s12 = inlined_call_operand.hbm [shape: f32[16,128], index: 12, kind: output, shape index: {}]  }
   0x1   :  { %17 = sst [smem:[#allocation4]] %s1637_s0 }
   0x2   :  { %18 = vsyncpa [#allocation7], 0  ;;  %s1428_s23 = smov 0   ;;  %s1430_s24 = smov 0  }
   0x3   :  { %s1432_s25 = smov 0  }
   0x4 LB: > { %s1444_s0 = sadd.s32 4294967295, %s1351_s25   ;;  %s1447_s26 = sadd.s32 1, %s1351_s25   ;;  %s1351_s25 = sphi %s1432_s25, %s1652_s25   ;;  %s1347_s24 = sphi %s1430_s24, %s1651_s24   ;;  %s1343_s23 = sphi %s1428_s23, %s1650_s23  }
   0x5   : > { %s28_s27 = ssub.s32 %s1351_s25, %s1447_s26  ;;  %s31_s28 = sadd.s32 1, %s1347_s24 }
   0x6   : > { %p29_p0 = scmp.eq.s32.totalorder %s28_s27, 0  ;;  %p38_p1 = scmp.ne.s32.totalorder %s1347_s24, %s1343_s23 }
   0x7   : > { %p39_p2 = scmp.eq.s32.totalorder %s1351_s25, 0  ;;  %p1116_p4 = scmp.ge.s32.totalorder %s1351_s25, 3 }
   0x8   : > { %s1456_s29 = scalar_select %p29_p0, %s1347_s24, %s31_s28  }
   0x9   : > { %p40_p3 = por %p39_p2, %p38_p1  ;;  %327 = sbr.rel (%p1116_p4) target bundleno = 23 (0x17), region = 52 }
  0x10   : > { %330 = sbr.rel (!%p40_p3) target bundleno = 23 (0x17), region = 56  ;;  %s332_s30 = sand.u32 (%p40_p3), 1, %s1347_s24  }
  0x11   : > { %s1161_s13 = sshll.u32 (%p40_p3), %s1351_s25, 4  ;;  %s1117_s14 = sshll.u32 (%p40_p3), %s332_s30, 5 }
  0x12   : > { %s337_s17 = scalar_lea.vmem (%p40_p3), %s1638_s1, %s1161_s13  ;;  %s334_s18 = scalar_lea.vmem (%p40_p3), [#allocation5], %s1117_s14 }
  0x13   : > { %v350_v0 = vld [vmem:[%s337_s17] sm:$0xff] (%p40_p3)  ;;  %v352_v1 = vld [vmem:[%s337_s17 + $0x8] sm:$0xff] (%p40_p3)  ;;  %v354_v2 = vld [vmem:[%s337_s17 + $0x30] sm:$0xff] (%p40_p3) }
  0x14   : > { %351 = vst [vmem:[%s334_s18] sm:$0xff] (%p40_p3), %v350_v0  ;;  %353 = vst [vmem:[%s334_s18 + $0x8] sm:$0xff] (%p40_p3), %v352_v1  ;;  %v356_v3 = vld [vmem:[%s337_s17 + $0x38] sm:$0xff] (%p40_p3) }
  0x15   : > { %355 = vst [vmem:[%s334_s18 + $0x10] sm:$0xff] (%p40_p3), %v354_v2  ;;  %357 = vst [vmem:[%s334_s18 + $0x18] sm:$0xff] (%p40_p3), %v356_v3 }
  0x17 PF: > { %p1120_p5 = scmp.ge.s32.totalorder %s1351_s25, 1  ;;  %p371_p6 = scmp.lt.s32.totalorder %s1351_s25, 4 }
  0x19   : > { %p372_p7 = pnand %p1120_p5, %p371_p6 }
  0x1a   : > { %s378_s19 = sand.u32 (!%p372_p7), 1, %s1343_s23   ;;  %s1122_s20 = sshll.u32 (!%p372_p7), %s1444_s0, 5 }
  0x1b   : > { %375 = sbr.rel (%p372_p7) target bundleno = 1403 (0x57b), region = 83  ;;  %s1121_s21 = sshll.u32 (!%p372_p7), %s378_s19, 5 }
  0x1c   : > { %p419_p8 = scmp.lt.s32.totalorder (!%p372_p7), %s1122_s20, 95  ;;  %s1473_s13 = scalar_lea.vmem (!%p372_p7), [#allocation5], %s1121_s21 }
  0x1d   : > { %p1124_p9 = scmp.ne.s32.totalorder (!%p372_p7), %s1444_s0, 0 }
  0x22   : > { %s1654_s20 = smov (!%p419_p8, %s1122_s20), 95  ;;  %428 = sbr.rel (%p1124_p9) target bundleno = 259 (0x103), region = 91 }
  0x23   : > { %s1123_s22 = sshll.u32 %s1654_s20, 2  ;;  %v1267_v4 = vld [vmem:[%s1641_s4] sm:$0xff] (!%p1124_p9)   ;;  %v1353_v5 = vmov (!%p1124_p9), 0.0   ;;  %v1268_v6 = vld [vmem:[%s1641_s4 + $0x8] sm:$0x7f] (!%p1124_p9)   ;;  %vm451_vm0 = vcmask (!%p1124_p9), 1046528  }
  0x24   : > { %s1471_s30 = scalar_lea.vmem %s1640_s3, %s1123_s22  ;;  %1196 = vmatprep.subr.bf16.mxu0 (!%p1124_p9), %v1353_v5  ;;  %v429_v7 = vld [vmem:[%s1639_s2] sm:$0xff] (!%p1124_p9)  ;;  %v430_v8 = vld [vmem:[%s1639_s2 + $0x8] sm:$0xff] (!%p1124_p9)  ;;  %v453_v9 = vsel (!%p1124_p9), %vm451_vm0, %v1268_v6, 0  ;;  %vm1354_vm1 = vmmov (!%p1124_p9), 0   ;;  %vm447_vm2 = vcmask (!%p1124_p9), 244736   ;;  %vm496_vm3 = vcmask (!%p1124_p9), 261120  }
  0x25   : > { %1197 = vmatpush3.bf16.msra.mxu0 (!%p1124_p9), %v1267_v4  ;;  %1200 = vmatprep.mubr.msk.bf16.mxu0 (!%p1124_p9), %vm1354_vm1, %v1353_v5  ;;  %v431_v10 = vpack.c.bf16 (!%p1124_p9), %v430_v8, %v429_v7 }
  0x26   : > { %1198 = vmatprep.subr.bf16.mxu0 (!%p1124_p9), %v1353_v5 }
  0x29   : > { %1199 = vmatpush3.bf16.msra.mxu0 %v453_v9 }
  0x2c   : > { %1201 = vmatmul.mubr.msk.bf16.vlgmr.msra.gmra.mrb[0].mxu0 %vm447_vm2, %v431_v10 }
  0xff   : > { %v489_v11 = vpop.f32.mrb[0].mxu0 }
 0x100   : > { %497 = vst.msk [vmem:[#allocation2] sm:$0xff] %vm496_vm3, %v489_v11  ;;  %v1202_v12 = vpop.f32.mrb[1].mxu0 }
 0x101   : > { %v492_v13 = vpop.f32.mrb[2].mxu0 }
 0x102   : > { %498 = vst.msk [vmem:[#allocation2 + $0x8] sm:$0xff] %vm496_vm3, %v492_v13  ;;  %v1203_v14 = vpop.f32.mrb[3].mxu0 }
 0x103 PF: > { %v1269_v15 = vld [vmem:[%s1471_s30 + $0x40] sm:$0xff]   ;;  %v1271_v17 = vld [vmem:[%s1471_s30 + $0x48] sm:$0xff]   ;;  %v1273_v19 = vld [vmem:[%s1471_s30 + $0x50] sm:$0xff]   ;;  %vm678_vm4 = vcmask 261120   ;;  %p1144_p10 = scmp.ne.s32.totalorder %s1444_s0, 2 }
 0x104   : > { %v1270_v16 = vld [vmem:[%s1471_s30] sm:$0xff]   ;;  %1165 = vmatprep.subr.bf16.mxu0 %v1269_v15  ;;  %v1272_v18 = vld [vmem:[%s1471_s30 + $0x8] sm:$0xff]   ;;  %v1274_v20 = vld [vmem:[%s1471_s30 + $0x10] sm:$0xff]   ;;  %s685_s20 = sld [smem:[#allocation4]] (!%p1144_p10)  ;;  %v1355_v48 = vmov (!%p1144_p10), 0.0   ;;  %vm1356_vm5 = vmmov (!%p1144_p10), 0   ;;  %v686_v51 = vlaneseq (!%p1144_p10) }
 0x105   : > { %1166 = vmatpush3.bf16.msra.mxu0 %v1270_v16  ;;  %v1275_v21 = vld [vmem:[%s1471_s30 + $0x58] sm:$0xff]   ;;  %v1277_v23 = vld [vmem:[%s1471_s30 + $0x60] sm:$0xff]   ;;  %v1279_v25 = vld [vmem:[%s1471_s30 + $0x68] sm:$0xff]   ;;  %1212 = vmatprep.subr.bf16.mxu1 (!%p1144_p10), %v1355_v48 }
 0x106   : > { %1167 = vmatprep.subr.bf16.mxu0 %v1271_v17  ;;  %v1276_v22 = vld [vmem:[%s1471_s30 + $0x18] sm:$0xff]   ;;  %v1278_v24 = vld [vmem:[%s1471_s30 + $0x20] sm:$0xff]   ;;  %v504_v27 = vld [vmem:[%s1473_s13 + $0x18] sm:$0xff]  ;;  %1216 = vmatprep.mubr.msk.bf16.mxu1 (!%p1144_p10), %vm1356_vm5, %v1355_v48  ;;  %v687_v53 = vshrl.u32 (!%p1144_p10), %v686_v51, 7 }
 0x107   : > { %v502_v26 = vld [vmem:[%s1473_s13 + $0x8] sm:$0xff]  ;;  %v1280_v29 = vld [vmem:[%s1471_s30 + $0x28] sm:$0xff]   ;;  %v1281_v30 = vld [vmem:[%s1471_s30 + $0x70] sm:$0xff]  }
 0x108   : > { %v506_v28 = vpack.c.bf16 %v504_v27, %v502_v26  ;;  %v1282_v31 = vld [vmem:[%s1471_s30 + $0x30] sm:$0xff]   ;;  %v1283_v32 = vld [vmem:[%s1471_s30 + $0x78] sm:$0xff]   ;;  %v503_v35 = vld [vmem:[%s1473_s13 + $0x10] sm:$0xff]  ;;  %v688_v54 = vadd.s32 (!%p1144_p10), 8, %v687_v53 }
 0x109   : > { %1168 = vmatpush3.bf16.msra.mxu0 %v1272_v18  ;;  %v1284_v33 = vld [vmem:[%s1471_s30 + $0x38] sm:$0xff]   ;;  %v501_v34 = vld [vmem:[%s1473_s13] sm:$0xff]  ;;  %v499_v38 = vld [vmem:[#allocation2] sm:$0xff] }
 0x10a   : > { %1169 = vmatprep.subr.bf16.mxu0 %v1273_v19  ;;  %667 = vmatprep.mubr.bf16.mxu0 %v506_v28  ;;  %v505_v36 = vpack.c.bf16 %v503_v35, %v501_v34  ;;  %v500_v42 = vld [vmem:[#allocation2 + $0x8] sm:$0xff]  ;;  %v1285_v47 = vld [vmem:[%s1643_s6] sm:$0xff] (!%p1144_p10)   ;;  %s696_s30 = scvt.s32.f32 (!%p1144_p10), %s685_s20  ;;  %v689_v55 = vstv (!%p1144_p10), %s685_s20 }
 0x10b   : > { %v1286_v49 = vld [vmem:[%s1643_s6 + $0x8] sm:$0xff] (!%p1144_p10)   ;;  %vm690_vm6 = vcmp.lt.s32.totalorder (!%p1144_p10), %v687_v53, %v689_v55  ;;  %vm691_vm7 = vcmp.lt.s32.totalorder (!%p1144_p10), %v688_v54, %v689_v55  ;;  %v702_v26 = vld [vmem:[%s1642_s5] sm:$0x3] (!%p1144_p10) }
 0x10c   : > { %v697_v50 = vstv (!%p1144_p10), %s696_s30  ;;  %v1526_v56 = vsel (!%p1144_p10), %vm690_vm6, 1.0, %v1355_v48  ;;  %v1529_v57 = vsel (!%p1144_p10), %vm691_vm7, 1.0, %v1355_v48 }
 0x10d   : > { %1170 = vmatpush3.bf16.msra.mxu0 %v1274_v20  ;;  %1291 = vrcp.f32 (!%p1144_p10), %v697_v50 }
 0x10e   : > { %1171 = vmatprep.subr.bf16.mxu0 %v1275_v21 }
 0x111   : > { %1172 = vmatpush3.bf16.msra.mxu0 %v1276_v22 }
 0x112   : > { %1173 = vmatprep.subr.bf16.mxu0 %v1277_v23 }
 0x115   : > { %1174 = vmatpush3.bf16.msra.mxu0 %v1278_v24 }
 0x116   : > { %1175 = vmatprep.subr.bf16.mxu0 %v1279_v25 }
 0x117   : > { %v1292_v52 = vpop.eup (!%p1144_p10), %1291 }
 0x118   : > { %1228 = vpush (!%p1144_p10), %v1292_v52 }
 0x119   : > { %1176 = vmatpush3.bf16.msra.mxu0 %v1280_v29  ;;  %v1546_v29 = vsub.s32 (!%p1144_p10), 0, %v687_v53 }
 0x11a   : > { %1177 = vmatprep.subr.bf16.mxu0 %v1281_v30 }
 0x11d   : > { %1178 = vmatpush3.bf16.msra.mxu0 %v1282_v31 }
 0x11e   : > { %1179 = vmatprep.subr.bf16.mxu0 %v1283_v32 }
 0x121   : > { %1180 = vmatpush3.bf16.msra.mxu0 %v1284_v33  ;;  %v1549_v33 = vsub.s32 (!%p1144_p10), 1, %v687_v53 }
 0x122   : > { %1204 = vmatprep.subr.bf16.mxu0 (!%p1144_p10), %v1355_v48 }
 0x124   : > { %668 = vmatmul.mubr.bf16.vlgmr.msra.gmra.mrb[0].mxu0 %v505_v36 }
 0x125   : > { %1205 = vmatpush3.bf16.msra.mxu0 (!%p1144_p10), %v1285_v47  ;;  %1208 = vmatprep.mubr.msk.bf16.mxu0 (!%p1144_p10), %vm1356_vm5, %v1355_v48 }
 0x126   : > { %1206 = vmatprep.subr.bf16.mxu0 (!%p1144_p10), %v1355_v48 }
 0x129   : > { %1207 = vmatpush3.bf16.msra.mxu0 (!%p1144_p10), %v1286_v49 }
 0x12a   : > { %1220 = vmatprep.subr.bf16.mxu0 (!%p1144_p10), %v1355_v48 }
 0x149   : > { %s1229_s13 = spop (!%p1144_p10), %1228 }
 0x14a   : > { %v1535_v7 = vstv (!%p1144_p10), %s1229_s13 }
 0x1f7   : > { %v1181_v37 = vpop.f32.mrb[0].mxu0 }
 0x1f8   : > { %v1182_v39 = vpop.f32.mrb[1].mxu0 }
 0x1f9   : > { %v1183_v40 = vadd.f32 %v1182_v39, %v1181_v37  ;;  %v1184_v41 = vpop.f32.mrb[2].mxu0  ;;  %684 = sbr.rel (%p1144_p10) target bundleno = 1377 (0x561), region = 95 }
 0x1fa   : > { %v1185_v43 = vpop.f32.mrb[3].mxu0 }
 0x1fb   : > { %v676_v44 = vadd.f32 %v1183_v40, %v499_v38  ;;  %v1186_v45 = vadd.f32 %v1185_v43, %v1184_v41  ;;  %v1287_v43 = vld [vmem:[%s1645_s8] sm:$0xff] (!%p1144_p10)  }
 0x1fc   : > { %1213 = vmatpush3.bf16.msra.mxu1 (!%p1144_p10), %v1287_v43 }
 0x1fd   : > { %679 = vst.msk [vmem:[#allocation2] sm:$0xff] %vm678_vm4, %v676_v44  ;;  %v677_v46 = vadd.f32 %v1186_v45, %v500_v42  ;;  %1214 = vmatprep.subr.bf16.mxu1 (!%p1144_p10), %v1355_v48  ;;  %v1288_v44 = vld [vmem:[%s1645_s8 + $0x8] sm:$0xff] (!%p1144_p10)  }
 0x1ff   : > { %680 = vst.msk [vmem:[#allocation2 + $0x8] sm:$0xff] %vm678_vm4, %v677_v46 }
 0x200   : > { %1215 = vmatpush3.bf16.msra.mxu1 %v1288_v44 }
 0x204   : > { %v700_v58 = vld [vmem:[#allocation2] sm:$0xff] }
 0x205   : > { %v703_v60 = vmul.f32 %v1526_v56, %v700_v58 }
 0x206   : > { %v701_v59 = vld [vmem:[#allocation2 + $0x8] sm:$0xff] }
 0x207   : > { %v704_v61 = vmul.f32 %v1529_v57, %v701_v59  ;;  %v705_v62 = vsel %vm678_vm4, %v703_v60, 0.0 }
 0x209   : > { %v706_v63 = vsel %vm678_vm4, %v704_v61, 0.0 }
 0x20a   : > { %v707_v0 = vadd.f32 %v706_v63, %v705_v62 }
 0x20c   : > { %v708_v1 = vrot.slane %v707_v0, 4 }
 0x20e   : > { %v709_v2 = vadd.f32 %v708_v1, %v707_v0 }
 0x210   : > { %v710_v3 = vrot.slane %v709_v2, 2 }
 0x212   : > { %v711_v4 = vadd.f32 %v710_v3, %v709_v2 }
 0x214   : > { %v712_v5 = vrot.slane %v711_v4, 1 }
 0x216   : > { %v713_v6 = vadd.f32 %v712_v5, %v711_v4 }
 0x218   : > { %v715_v8 = vmul.f32 %v1535_v7, %v713_v6 }
 0x21a   : > { %v716_v9 = vsub.f32 %v700_v58, %v715_v8  ;;  %v717_v10 = vsub.f32 %v701_v59, %v715_v8 }
 0x21c   : > { %v718_v11 = vmul.f32 %v1526_v56, %v716_v9  ;;  %v719_v12 = vmul.f32 %v1529_v57, %v717_v10 }
 0x21e   : > { %v720_v13 = vmul.f32 %v718_v11, %v718_v11  ;;  %v721_v14 = vmul.f32 %v719_v12, %v719_v12 }
 0x220   : > { %v722_v15 = vsel %vm678_vm4, %v720_v13, 0.0  ;;  %v723_v16 = vsel %vm678_vm4, %v721_v14, 0.0 }
 0x221   : > { %v724_v17 = vadd.f32 %v723_v16, %v722_v15 }
 0x223   : > { %v725_v18 = vrot.slane %v724_v17, 4 }
 0x225   : > { %v726_v19 = vadd.f32 %v725_v18, %v724_v17  ;;  %v815_v18 = vld [vmem:[%s1644_s7] sm:$0x3] }
 0x227   : > { %v727_v20 = vrot.slane %v726_v19, 2 }
 0x229   : > { %v728_v21 = vadd.f32 %v727_v20, %v726_v19 }
 0x22b   : > { %v729_v22 = vrot.slane %v728_v21, 1 }
 0x22d   : > { %v730_v23 = vadd.f32 %v729_v22, %v728_v21 }
 0x22f   : > { %v731_v24 = vmul.f32 %v730_v23, %v1535_v7 }
 0x231   : > { %v732_v25 = vadd.f32 1e-05, %v731_v24 }
 0x233   : > { %1293 = vrsqrt.f32 %v732_v25 }
 0x23d   : > { %v1294_v27 = vpop.eup %1293 }
 0x23e   : > { %v734_v28 = vmul.f32 %v1294_v27, %v702_v26 }
 0x240   : > { %v735_v30 = vmul.f32 %v734_v28, %v715_v8  ;;  %v743_v32 = vrot.slane %v734_v28, %v1546_v29 }
 0x242   : > { %v737_v31 = vrot.slane %v735_v30, 7  ;;  %v744_v35 = vmul.f32 %v743_v32, %v700_v58  ;;  %v745_v36 = vmul.f32 %v743_v32, %v701_v59 }
 0x244   : > { %v739_v34 = vsub.f32 %v702_v26, %v737_v31 }
 0x246   : > { %v749_v37 = vrot.slane %v739_v34, %v1549_v33 }
 0x248   : > { %v750_v38 = vadd.f32 %v749_v37, %v744_v35  ;;  %v751_v39 = vadd.f32 %v749_v37, %v745_v36  ;;  %v1289_v35 = vld [vmem:[%s1647_s10] sm:$0xff]   ;;  %v1290_v36 = vld [vmem:[%s1647_s10 + $0x8] sm:$0xff]  }
 0x24a   : > { %v752_v40 = vmax.f32 %v750_v38, 0.0  ;;  %v753_v41 = vmax.f32 %v751_v39, 0.0 }
 0x24c   : > { %v754_v42 = vpack.c.bf16 %v753_v41, %v752_v40 }
 0x24e   : > { %1209 = vmatmul.mubr.msk.bf16.vlgmr.msra.gmra.mrb[0].mxu0 %vm678_vm4, %v754_v42 }
 0x24f   : > { %1224 = vmatprep.mubr.msk.bf16.mxu0 %vm1356_vm5, %v1355_v48  ;;  %1221 = vmatpush3.bf16.msra.mxu0 %v1289_v35 }
 0x250   : > { %1222 = vmatprep.subr.bf16.mxu0 %v1355_v48 }
 0x253   : > { %1223 = vmatpush3.bf16.msra.mxu0 %v1290_v36 }
 0x321   : > { %v808_v45 = vpop.f32.mrb[0].mxu0 }
 0x322   : > { %v816_v46 = vmul.f32 %v1526_v56, %v808_v45  ;;  %v1210_v47 = vpop.f32.mrb[1].mxu0 }
 0x323   : > { %v811_v49 = vpop.f32.mrb[2].mxu0 }
 0x324   : > { %v817_v50 = vmul.f32 %v1529_v57, %v811_v49  ;;  %v1211_v51 = vpop.f32.mrb[3].mxu0  ;;  %v818_v52 = vsel %vm678_vm4, %v816_v46, 0.0 }
 0x326   : > { %v819_v53 = vsel %vm678_vm4, %v817_v50, 0.0 }
 0x327   : > { %v820_v54 = vadd.f32 %v819_v53, %v818_v52 }
 0x329   : > { %v821_v55 = vrot.slane %v820_v54, 4 }
 0x32b   : > { %v822_v58 = vadd.f32 %v821_v55, %v820_v54 }
 0x32d   : > { %v823_v59 = vrot.slane %v822_v58, 2 }
 0x32f   : > { %v824_v60 = vadd.f32 %v823_v59, %v822_v58 }
 0x331   : > { %v825_v61 = vrot.slane %v824_v60, 1 }
 0x333   : > { %v826_v62 = vadd.f32 %v825_v61, %v824_v60 }
 0x335   : > { %v827_v63 = vmul.f32 %v826_v62, %v1535_v7 }
 0x337   : > { %v828_v0 = vsub.f32 %v808_v45, %v827_v63  ;;  %v829_v1 = vsub.f32 %v811_v49, %v827_v63 }
 0x339   : > { %v830_v2 = vmul.f32 %v1526_v56, %v828_v0  ;;  %v831_v3 = vmul.f32 %v1529_v57, %v829_v1 }
 0x33b   : > { %v832_v4 = vmul.f32 %v830_v2, %v830_v2  ;;  %v833_v5 = vmul.f32 %v831_v3, %v831_v3 }
 0x33d   : > { %v834_v6 = vsel %vm678_vm4, %v832_v4, 0.0  ;;  %v835_v8 = vsel %vm678_vm4, %v833_v5, 0.0 }
 0x33e   : > { %v836_v9 = vadd.f32 %v835_v8, %v834_v6 }
 0x340   : > { %v837_v10 = vrot.slane %v836_v9, 4 }
 0x342   : > { %v838_v11 = vadd.f32 %v837_v10, %v836_v9 }
 0x344   : > { %v839_v12 = vrot.slane %v838_v11, 2 }
 0x346   : > { %v840_v13 = vadd.f32 %v839_v12, %v838_v11 }
 0x348   : > { %v841_v14 = vrot.slane %v840_v13, 1 }
 0x34a   : > { %v842_v15 = vadd.f32 %v841_v14, %v840_v13 }
 0x34c   : > { %v843_v16 = vmul.f32 %v842_v15, %v1535_v7 }
 0x34e   : > { %v844_v17 = vadd.f32 1e-05, %v843_v16 }
 0x350   : > { %1295 = vrsqrt.f32 %v844_v17 }
 0x35a   : > { %v1296_v19 = vpop.eup %1295 }
 0x35b   : > { %v846_v20 = vmul.f32 %v1296_v19, %v815_v18 }
 0x35d   : > { %v847_v21 = vmul.f32 %v846_v20, %v827_v63  ;;  %v855_v22 = vrot.slane %v846_v20, %v1546_v29 }
 0x35f   : > { %v849_v23 = vrot.slane %v847_v21, 7  ;;  %v856_v24 = vmul.f32 %v855_v22, %v808_v45  ;;  %v857_v25 = vmul.f32 %v855_v22, %v811_v49  ;;  %v1153_v21 = vld [vmem:[%s1648_s11] ss:$0 sm:$0xff] }
 0x361   : > { %v851_v26 = vsub.f32 %v815_v18, %v849_v23 }
 0x363   : > { %v861_v27 = vrot.slane %v851_v26, %v1549_v33 }
 0x365   : > { %v863_v28 = vadd.f32 %v861_v27, %v857_v25  ;;  %v862_v30 = vadd.f32 %v861_v27, %v856_v24 }
 0x367   : > { %v864_v31 = vmax.f32 %v862_v30, 0.0  ;;  %v865_v32 = vmax.f32 %v863_v28, 0.0 }
 0x369   : > { %v866_v34 = vpack.c.bf16 %v865_v32, %v864_v31 }
 0x36b   : > { %1217 = vmatmul.mubr.msk.bf16.vlgmr.msra.gmra.mrb[0].mxu1 %vm678_vm4, %v866_v34 }
 0x43e   : > { %v920_v37 = vpop.f32.mrb[0].mxu1 }
 0x43f   : > { %v928_v38 = vmul.f32 %v1526_v56, %v920_v37  ;;  %v1218_v39 = vpop.f32.mrb[1].mxu1 }
 0x440   : > { %v923_v40 = vpop.f32.mrb[2].mxu1 }
 0x441   : > { %v929_v41 = vmul.f32 %v1529_v57, %v923_v40  ;;  %v1219_v42 = vpop.f32.mrb[3].mxu1  ;;  %v930_v43 = vsel %vm678_vm4, %v928_v38, 0.0 }
 0x443   : > { %v931_v44 = vsel %vm678_vm4, %v929_v41, 0.0 }
 0x444   : > { %v932_v45 = vadd.f32 %v931_v44, %v930_v43 }
 0x446   : > { %v933_v46 = vrot.slane %v932_v45, 4 }
 0x448   : > { %v934_v48 = vadd.f32 %v933_v46, %v932_v45 }
 0x44a   : > { %v935_v47 = vrot.slane %v934_v48, 2 }
 0x44c   : > { %v936_v49 = vadd.f32 %v935_v47, %v934_v48 }
 0x44e   : > { %v937_v50 = vrot.slane %v936_v49, 1 }
 0x450   : > { %v938_v51 = vadd.f32 %v937_v50, %v936_v49 }
 0x452   : > { %v939_v52 = vmul.f32 %v938_v51, %v1535_v7 }
 0x454   : > { %v940_v53 = vsub.f32 %v920_v37, %v939_v52  ;;  %v941_v54 = vsub.f32 %v923_v40, %v939_v52 }
 0x456   : > { %v942_v55 = vmul.f32 %v1526_v56, %v940_v53  ;;  %v943_v58 = vmul.f32 %v1529_v57, %v941_v54  ;;  %v927_v56 = vld [vmem:[%s1646_s9] sm:$0x3] }
 0x458   : > { %v944_v59 = vmul.f32 %v942_v55, %v942_v55  ;;  %v945_v60 = vmul.f32 %v943_v58, %v943_v58 }
 0x45a   : > { %v946_v61 = vsel %vm678_vm4, %v944_v59, 0.0  ;;  %v947_v62 = vsel %vm678_vm4, %v945_v60, 0.0 }
 0x45b   : > { %v948_v63 = vadd.f32 %v947_v62, %v946_v61 }
 0x45d   : > { %v949_v0 = vrot.slane %v948_v63, 4 }
 0x45f   : > { %v950_v1 = vadd.f32 %v949_v0, %v948_v63 }
 0x461   : > { %v951_v2 = vrot.slane %v950_v1, 2 }
 0x463   : > { %v952_v3 = vadd.f32 %v951_v2, %v950_v1 }
 0x465   : > { %v953_v4 = vrot.slane %v952_v3, 1 }
 0x467   : > { %v954_v5 = vadd.f32 %v953_v4, %v952_v3 }
 0x469   : > { %v955_v6 = vmul.f32 %v954_v5, %v1535_v7 }
 0x46b   : > { %v956_v8 = vadd.f32 1e-05, %v955_v6 }
 0x46d   : > { %1297 = vrsqrt.f32 %v956_v8 }
 0x477   : > { %v1298_v57 = vpop.eup %1297 }
 0x478   : > { %v958_v9 = vmul.f32 %v1298_v57, %v927_v56 }
 0x47a   : > { %v959_v10 = vmul.f32 %v958_v9, %v939_v52  ;;  %v967_v11 = vrot.slane %v958_v9, %v1546_v29 }
 0x47c   : > { %v961_v12 = vrot.slane %v959_v10, 7  ;;  %v968_v13 = vmul.f32 %v967_v11, %v920_v37  ;;  %v969_v14 = vmul.f32 %v967_v11, %v923_v40 }
 0x47e   : > { %v963_v15 = vsub.f32 %v927_v56, %v961_v12 }
 0x480   : > { %v973_v16 = vrot.slane %v963_v15, %v1549_v33 }
 0x482   : > { %v974_v17 = vadd.f32 %v973_v16, %v968_v13  ;;  %v975_v18 = vadd.f32 %v973_v16, %v969_v14 }
 0x484   : > { %v977_v7 = vmax.f32 %v975_v18, 0.0  ;;  %v976_v19 = vmax.f32 %v974_v17, 0.0 }
 0x486   : > { %v978_v20 = vpack.c.bf16 %v977_v7, %v976_v19 }
 0x488   : > { %1225 = vmatmul.mubr.msk.bf16.vlgmr.msra.gmra.mrb[4].mxu0 %vm678_vm4, %v978_v20 }
 0x55b   : > { %v1039_v22 = vpop.f32.mrb[4].mxu0 }
 0x55c   : > { %v1040_v23 = vadd.f32 %v1153_v21, %v1039_v22  ;;  %v1226_v29 = vpop.f32.mrb[5].mxu0 }
 0x55d   : > { %v1042_v24 = vpop.f32.mrb[6].mxu0 }
 0x55e   : > { %1046 = vst [vmem:[#allocation6] sm:$0xff] %v1040_v23  ;;  %v1043_v25 = vadd.f32 %v1153_v21, %v1042_v24  ;;  %v1227_v26 = vpop.f32.mrb[7].mxu0 }
 0x560   : > { %1047 = vst [vmem:[#allocation6 + $0x8] sm:$0xff] %v1043_v25 }
 0x561 PF: > { %p1234_p11 = scmp.eq.s32.totalorder %s1444_s0, 2  ;;  %s1357_s14 = smov [#allocation6]  }
 0x562   : > { %s1054_s23 = sshll.u32 %s1357_s14, 4  ;;  %s1055_s23 = int_to_ptr.vmem [resolvable:$true] %s1054_s23 }
 0x563   : > { %s1299_s15 = scalar_lea.vmem %s1055_s23, 256  ;;  %p1306_p1 = scmp.lt.s32.totalorder %s1055_s23, %s1055_s23 }
 0x564   : > { %p1300_p12 = scmp.ne.s32.totalorder %s1055_s23, %s1299_s15  ;;  %p1307_p2 = scmp.lt.s32.totalorder %s1299_s15, %s1299_s15 }
 0x566   : > { %p1301_p13 = pnand %p1300_p12, %p1234_p11  ;;  %p1308_p3 = por %p1307_p2, %p1306_p1 }
 0x568   : > { %p1302_p0 = pneg %p1301_p13 }
 0x56a   : > { %p1309_p4 = pnand %p1308_p3, %p1302_p0 }
 0x56c   : > { %1312 = shalt.err (!%p1309_p4)
}
 0x56d   : > { %s1313_s18 = scalar_lea.hbm %s1649_s12, 256 }
 0x56e   : > { %p1314_p5 = scmp.ne.s32.totalorder %s1649_s12, %s1313_s18  ;;  %p1319_p8 = scmp.lt.u32.totalorder %s1313_s18, %s1649_s12 }
 0x570   : > { %p1315_p6 = pnand %p1314_p5, %p1234_p11 }
 0x572   : > { %p1316_p7 = pneg %p1315_p6 }
 0x574   : > { %p1321_p9 = pnand %p1319_p8, %p1316_p7 }
 0x576   : > { %1324 = shalt.err (!%p1321_p9)
}
 0x577   : > { %s1358_s27 = smov 128   ;;  %s1359_s28 = smov 8  }
 0x578   : > { %1231 = dma.vmem_to_hbm [thread:$0]  (%p1234_p11), %s1055_s23, 256, %s1649_s12, [#allocation7], %s1358_s27, %s1358_s27, %s1359_s28  }
 0x579   : > { %1338 = dma.done.wait (%p1234_p11), [#allocation7], 256  }
 0x57a   : > { %1340 = vsyncadd (%p1234_p11), [#allocation7], 4294967040 }
 0x57b PF: > { %p21_p10 = scmp.ge.s32.totalorder %s1447_s26, 5   ;;  %s1650_s23 = smov %s1347_s24 }
 0x57c   : > { %s1651_s24 = smov %s1456_s29  ;;  %s1652_s25 = smov %s1447_s26 }
 0x57d   :  { %23 = sbr.rel (!%p21_p10) target bundleno = 4 (0x4), region = 130 }
 0x584   :  { %1070 = vsyncpa [#allocation7], 1 }
 0x585   :  { %1072 = vsyncpa [#allocation7 + $0x1], 1 }

</bundles_post_ra>
